<compile_context>
chip_gen: v5e
topology: v5e:2x2
jax: 0.10.0
libtpu: 0.0.40
codegen_flags: <defaults>
</compile_context>

<pallas_src>
import functools
import math
from types import SimpleNamespace

import jax
import jax.numpy as jnp
import numpy as np
from jax.experimental import pallas as pl
from jax.experimental.pallas import tpu as pltpu

# BalancedL1Loss defaults (reduction='none')
ALPHA = 0.5
GAMMA = 1.5
BETA = 1.0


def _round_up(x, m):
    return ((x + m - 1) // m) * m


def _pick_lane_tile(m):
    """Large lane tiles (8K-32K) amortise the ~0.35us per-step pipeline
    overhead; keep >= 2 grid steps so v7x's two TensorCores both get work."""
    mp = _round_up(m, 128)
    half = max(_round_up((mp + 1) // 2, 128), 128)
    tm = max(8192, _round_up(pl.cdiv(mp, 8), 128))
    return max(min(tm, half, 32768), 128)


def _multibox_kernel(lab_ref, cls_ref, regr_ref, gt_ref, negce_ref, part_ref,
                     *, m_total, tm, pos_label, neg_label, n_part_rows):
    lab = lab_ref[...]                                            # (1, TM) int32

    # Mask the ragged tail of the last grid step: values there come from a
    # clipped DMA and are unspecified, so gate every mask/sum on global index.
    gidx = pl.program_id(0) * tm + jax.lax.broadcasted_iota(jnp.int32, (1, tm), 1)
    valid = gidx < m_total
    pos = valid & (lab == pos_label)                              # (1, TM) bool
    neg = valid & (lab == neg_label)

    # ---- Balanced L1 (reduction='none'), masked to positive anchors --------
    x = jnp.abs(regr_ref[...].astype(jnp.float32)
                - gt_ref[...].astype(jnp.float32))                # (D, TM)
    b = math.exp(GAMMA / ALPHA) - 1.0
    inlier = ALPHA / b * (b * x + 1.0) * jnp.log(b * x / BETA + 1.0) - ALPHA * x
    outlier = GAMMA * x + GAMMA / b - ALPHA * BETA
    bl1 = jnp.where(x < BETA, inlier, outlier)                    # (D, TM)
    bl1 = jnp.where(pos, bl1, 0.0)                                # mask (bcast over D)

    # ---- 2-class cross entropy as ONE stable softplus on a (1, TM) row -----
    # CE(target=t) = softplus(l_{1-t} - l_t);  softplus(-d) = softplus(d) - d.
    logit0 = cls_ref[0:1, :].astype(jnp.float32)                  # (1, TM)
    logit1 = cls_ref[1:2, :].astype(jnp.float32)
    dp = (logit0 - logit1) if pos_label == 1 else (logit1 - logit0)
    sp = jnp.maximum(dp, 0.0) + jnp.log(1.0 + jnp.exp(-jnp.abs(dp)))
    ce_pos = sp                                                   # CE, target = pos_label
    ce_neg = sp - dp                                              # CE, target = neg_label

    # -1 sentinel: real CE >= 0, so non-negative anchors can never be selected
    # by the hard-negative threshold search in the wrapper.
    negce_ref[...] = jnp.where(neg, ce_neg, -1.0)

    # ---- all scalar reductions fused into a single (n_rows, TM) lane reduce
    pieces = [
        bl1,                                                      # rows 0..D-1
        jnp.where(pos, ce_pos, 0.0),                              # row D+0: pos CE sum
        jnp.where(pos & (ce_pos != 0.0), 1.0, 0.0),               # row D+1: nnz(pos CE)
        pos.astype(jnp.float32),                                  # row D+2: #positive
        neg.astype(jnp.float32),                                  # row D+3: #negative
    ]
    pad_rows = n_part_rows - (bl1.shape[0] + 4)
    if pad_rows:
        pieces.append(jnp.zeros((pad_rows, bl1.shape[1]), jnp.float32))
    stats = jnp.concatenate(pieces, axis=0)                       # (n_rows, TM)
    sums = jnp.sum(stats, axis=-1, keepdims=True)                 # (n_rows, 1)
    part_ref[...] = jnp.broadcast_to(sums, (n_part_rows, 128))


def _kth_largest(vals, k):
    """Exact k-th largest entry of `vals` (f32; entries < 0 are never selected
    because all candidates are >= 0).  31 vectorised count passes on the
    IEEE-754 bit pattern replace a full descending sort.  Undefined for k==0
    (callers must guard)."""
    keys = jax.lax.bitcast_convert_type(vals, jnp.int32)          # monotone for vals >= 0

    def step(i, prefix):
        cand = prefix | (jnp.int32(1) << (jnp.int32(30) - i))
        cnt = jnp.sum((keys >= cand).astype(jnp.int32))
        return jnp.where(cnt >= k, cand, prefix)

    kth_key = jax.lax.fori_loop(0, 31, step, jnp.int32(0))
    return jax.lax.bitcast_convert_type(kth_key, jnp.float32)


def multibox_loss_channel_major(pred_cls_cm, pred_regr_cm, gt_bboxes_cm,
                                labels, cfg, tm=None):
    """MultiBoxLoss forward on channel-major inputs (zero wrapper copies).

    pred_cls_cm : (C, M) logits (C == 2)      pred_regr_cm / gt_bboxes_cm : (D, M)
    labels      : (M,) or (1, M) int anchor labels {pos, neg, ignore}
    The three big tensors may be bf16; the kernel upcasts to f32.
    """
    C, M = pred_cls_cm.shape
    D = pred_regr_cm.shape[0]
    assert pred_regr_cm.shape == (D, M) and gt_bboxes_cm.shape == (D, M)
    # TODO(synk): only the 2-class (text / non-text) head is supported here; a
    # general-C CrossEntropy head would need the one-hot log-softmax path.
    assert C == 2, "MultiBoxLoss Pallas kernel supports 2-class heads only"
    pos_label = int(cfg.ANCHOR_POSITIVE_LABEL)
    neg_label = int(cfg.ANCHOR_NEGATIVE_LABEL)
    assert {pos_label, neg_label} == {0, 1}

    lab = labels.reshape(1, M).astype(jnp.int32)
    if tm is None:
        tm = _pick_lane_tile(M)
    num_tiles = pl.cdiv(M, tm)
    n_rows = _round_up(D + 4, 8)

    kernel = functools.partial(
        _multibox_kernel, m_total=M, tm=tm,
        pos_label=pos_label, neg_label=neg_label, n_part_rows=n_rows)

    neg_ce, partials = pl.pallas_call(
        kernel,
        out_shape=(
            jax.ShapeDtypeStruct((1, M), jnp.float32),
            jax.ShapeDtypeStruct((num_tiles * n_rows, 128), jnp.float32),
        ),
        grid_spec=pltpu.PrefetchScalarGridSpec(
            num_scalar_prefetch=0,
            grid=(num_tiles,),
            in_specs=[pl.BlockSpec((1, tm), lambda i: (0, i)),
                      pl.BlockSpec((C, tm), lambda i: (0, i)),
                      pl.BlockSpec((D, tm), lambda i: (0, i)),
                      pl.BlockSpec((D, tm), lambda i: (0, i))],
            out_specs=[pl.BlockSpec((1, tm), lambda i: (0, i)),
                       pl.BlockSpec((n_rows, 128), lambda i: (i, 0))],
        ),
        compiler_params=pltpu.CompilerParams(
            dimension_semantics=("parallel",),
            vmem_limit_bytes=48 * 1024 * 1024),
    )(lab, pred_cls_cm, pred_regr_cm, gt_bboxes_cm)

    # ---- per-tile partials -> global scalars (each row is a lane-bcast scalar)
    part = partials.reshape(num_tiles, n_rows, 128)[:, :, 0].sum(axis=0)
    reg_total = jnp.sum(part[:D])
    pos_ce_total = part[D + 0]
    pos_ce_nnz = part[D + 1]
    pos_total = part[D + 2]
    neg_total = part[D + 3]

    # localization: lambda_reg / Nv * sum(balanced_l1 over positive anchors).
    # (max(Nv,1) guards Nv==0, where the torch module would error / NaN.)
    Nv = pos_total
    localization_loss = cfg.LOSS_LAMBDA_REG / jnp.maximum(Nv, 1.0) * reg_total

    # Hard-negative mining: K = int(min(num_pos*ratio, num_neg)); then the sum
    # and nonzero-count of the K largest negative CE values.  torch.topk with a
    # data-dependent K is replaced by an exact K-th-order-statistic threshold:
    # everything strictly above the threshold is selected, plus the remaining
    # (K - count_above) tie copies of the threshold itself.
    K = jnp.minimum(Nv * cfg.LOSS_NEG_POS_RATIO, neg_total).astype(jnp.int32)
    neg_ce_flat = neg_ce.reshape(-1)
    thresh = _kth_largest(neg_ce_flat, K)
    above = neg_ce_flat > thresh
    n_above = jnp.sum(above.astype(jnp.float32))
    s_above = jnp.sum(jnp.where(above, neg_ce_flat, 0.0))
    n_tie = K.astype(jnp.float32) - n_above
    hard_sum = jnp.where(K > 0, s_above + thresh * n_tie, 0.0)
    hard_nnz = jnp.where(K > 0,
                         n_above + jnp.where(thresh != 0.0, n_tie, 0.0), 0.0)

    # Ns uses exact !=0 counts (mirrors torch.count_nonzero); max(Ns,1) guards
    # the Ns==0 case where torch would divide by zero.
    Ns = pos_ce_nnz + hard_nnz
    confidence_loss = (cfg.LOSS_LAMBDA_CLS / jnp.maximum(Ns, 1.0)
                       * (pos_ce_total + hard_sum))
    return localization_loss, confidence_loss


def multibox_loss(pred_cls, pred_regr, gt_bboxes, labels, cfg, tm=None):
    """Anchor-major entry matching the torch module's layout:
       pred_cls (N, A, C), pred_regr/gt_bboxes (N, A, D), labels (N, A).
    Does exactly one fused transpose per big tensor (layout plumbing only; no
    pad pass — the kernel masks the ragged tail by global index).  Callers that
    already hold channel-major tensors (CTPN conv heads are NCHW) should call
    multibox_loss_channel_major directly and skip these copies."""
    N, A, C = pred_cls.shape
    D = pred_regr.shape[-1]
    M = N * A
    cls_cm = jnp.transpose(pred_cls.reshape(M, C))
    regr_cm = jnp.transpose(pred_regr.reshape(M, D))
    gt_cm = jnp.transpose(gt_bboxes.reshape(M, D))
    return multibox_loss_channel_major(cls_cm, regr_cm, gt_cm,
                                       labels.reshape(M), cfg, tm=tm)


def _reference(pred_cls, pred_regr, gt_bboxes, labels, cfg):
    """Pure numpy re-implementation of the PyTorch forward (for validation)."""
    pc = np.asarray(pred_cls, np.float32)
    pr = np.asarray(pred_regr, np.float32)
    gt = np.asarray(gt_bboxes, np.float32)
    lab = np.asarray(labels)

    pos = lab == cfg.ANCHOR_POSITIVE_LABEL
    neg = lab == cfg.ANCHOR_NEGATIVE_LABEL

    x = np.abs(pr[pos] - gt[pos])
    b = np.exp(GAMMA / ALPHA) - 1.0
    l1 = np.where(x < BETA,
                  ALPHA / b * (b * x + 1.0) * np.log(b * x / BETA + 1.0) - ALPHA * x,
                  GAMMA * x + GAMMA / b - ALPHA * BETA)
    Nv = l1.shape[0]
    loc = cfg.LOSS_LAMBDA_REG / Nv * l1.sum()

    def ce(logits, t):
        m = logits.max(axis=1, keepdims=True)
        z = logits - m
        logp = z - np.log(np.exp(z).sum(axis=1, keepdims=True))
        return -logp[np.arange(len(t)), t]

    pos_ce = ce(pc[pos], lab[pos])
    neg_ce = ce(pc[neg], lab[neg])
    K = int(min(pos.sum() * cfg.LOSS_NEG_POS_RATIO, neg.sum()))
    hard = np.sort(neg_ce)[::-1][:K]
    Ns = np.count_nonzero(pos_ce) + np.count_nonzero(hard)
    conf = cfg.LOSS_LAMBDA_CLS / Ns * (pos_ce.sum() + hard.sum())
    return np.float32(loc), np.float32(conf)


if __name__ == "__main__":
    cfg = SimpleNamespace(
        LOSS_LAMBDA_REG=1.0,
        LOSS_LAMBDA_CLS=1.0,
        LOSS_NEG_POS_RATIO=3.0,
        ANCHOR_IGNORE_LABEL=-1,
        ANCHOR_POSITIVE_LABEL=1,
        ANCHOR_NEGATIVE_LABEL=0,
    )

    # Small shapes: batch=2 images, 512 anchors each, 2 classes, 4 regression dims.
    N, A, C, D = 2, 512, 2, 4
    key = jax.random.PRNGKey(0)
    k1, k2, k3, k4 = jax.random.split(key, 4)

    pred_cls = jax.random.normal(k1, (N, A, C), dtype=jnp.float32)
    pred_regr = jax.random.normal(k2, (N, A, D), dtype=jnp.float32)
    gt_bboxes = jax.random.normal(k3, (N, A, D), dtype=jnp.float32)
    u = jax.random.uniform(k4, (N, A))
    # ~15% positive, ~60% negative, rest ignored (label -1).
    labels = jnp.where(u < 0.15, cfg.ANCHOR_POSITIVE_LABEL,
                       jnp.where(u < 0.75, cfg.ANCHOR_NEGATIVE_LABEL,
                                 cfg.ANCHOR_IGNORE_LABEL)).astype(jnp.int32)

    loss_fn = jax.jit(functools.partial(multibox_loss, cfg=cfg))
    loc, conf = loss_fn(pred_cls, pred_regr, gt_bboxes, labels)
    loc = jax.block_until_ready(loc)
    conf = jax.block_until_ready(conf)

    loc_ref, conf_ref = _reference(pred_cls, pred_regr, gt_bboxes, labels, cfg)
    np.testing.assert_allclose(np.asarray(loc), loc_ref, rtol=1e-4, atol=1e-5)
    np.testing.assert_allclose(np.asarray(conf), conf_ref, rtol=1e-4, atol=1e-5)

    print("KERNEL_OK")
</pallas_src>

<mosaic_0001>
module attributes {stable_mosaic.version = 11 : i64} {
  func.func @_multibox_kernel(%arg0: i32, %arg1: memref<1x512xi32, #tpu.memory_space<vmem>>, %arg2: memref<2x512xf32, #tpu.memory_space<vmem>>, %arg3: memref<4x512xf32, #tpu.memory_space<vmem>>, %arg4: memref<4x512xf32, #tpu.memory_space<vmem>>, %arg5: memref<1x512xf32, #tpu.memory_space<vmem>>, %arg6: memref<8x128xf32, #tpu.memory_space<vmem>>) attributes {dimension_semantics = [#tpu.dimension_semantics<parallel>], iteration_bounds = array<i64: 2>, scalar_prefetch = 0 : i64, scratch_operands = 0 : i64, tpu.core_type = #tpu.core_type<tc>, window_params = [{transform_indices = @transform_0, window_bounds = array<i64: 1, 512>}, {transform_indices = @transform_1, window_bounds = array<i64: 2, 512>}, {transform_indices = @transform_2, window_bounds = array<i64: 4, 512>}, {transform_indices = @transform_3, window_bounds = array<i64: 4, 512>}, {transform_indices = @transform_4, window_bounds = array<i64: 1, 512>}, {transform_indices = @transform_5, window_bounds = array<i64: 8, 128>}]} {
    %c0 = arith.constant 0 : index
    %c0_0 = arith.constant 0 : index
    %0 = vector.load %arg1[%c0, %c0_0] : memref<1x512xi32, #tpu.memory_space<vmem>>, vector<1x512xi32>
    %c512_i32 = arith.constant 512 : i32
    %1 = arith.muli %arg0, %c512_i32 : i32
    %2 = tpu.iota {dimensions = array<i32: 1>} : vector<1x512xi32>
    %3 = vector.broadcast %1 : i32 to vector<1x512xi32>
    %4 = arith.addi %3, %2 : vector<1x512xi32>
    %c1024_i32 = arith.constant 1024 : i32
    %5 = vector.broadcast %c1024_i32 : i32 to vector<1x512xi32>
    %6 = arith.cmpi slt, %4, %5 : vector<1x512xi32>
    %c1_i32 = arith.constant 1 : i32
    %7 = vector.broadcast %c1_i32 : i32 to vector<1x512xi32>
    %8 = arith.cmpi eq, %0, %7 : vector<1x512xi32>
    %9 = arith.andi %6, %8 : vector<1x512xi1>
    %c0_i32 = arith.constant 0 : i32
    %10 = vector.broadcast %c0_i32 : i32 to vector<1x512xi32>
    %11 = arith.cmpi eq, %0, %10 : vector<1x512xi32>
    %12 = arith.andi %6, %11 : vector<1x512xi1>
    %c0_1 = arith.constant 0 : index
    %c0_2 = arith.constant 0 : index
    %13 = vector.load %arg3[%c0_1, %c0_2] : memref<4x512xf32, #tpu.memory_space<vmem>>, vector<4x512xf32>
    %c0_3 = arith.constant 0 : index
    %c0_4 = arith.constant 0 : index
    %14 = vector.load %arg4[%c0_3, %c0_4] : memref<4x512xf32, #tpu.memory_space<vmem>>, vector<4x512xf32>
    %15 = arith.subf %13, %14 : vector<4x512xf32>
    %16 = math.absf %15 : vector<4x512xf32>
    %cst = arith.constant 19.085537 : f32
    %17 = vector.broadcast %cst : f32 to vector<4x512xf32>
    %18 = arith.mulf %17, %16 : vector<4x512xf32>
    %cst_5 = arith.constant 1.000000e+00 : f32
    %19 = vector.broadcast %cst_5 : f32 to vector<4x512xf32>
    %20 = arith.addf %18, %19 : vector<4x512xf32>
    %cst_6 = arith.constant 0.0261978488 : f32
    %21 = vector.broadcast %cst_6 : f32 to vector<4x512xf32>
    %22 = arith.mulf %21, %20 : vector<4x512xf32>
    %cst_7 = arith.constant 19.085537 : f32
    %23 = vector.broadcast %cst_7 : f32 to vector<4x512xf32>
    %24 = arith.mulf %23, %16 : vector<4x512xf32>
    %cst_8 = arith.constant 1.000000e+00 : f32
    %25 = vector.broadcast %cst_8 : f32 to vector<4x512xf32>
    %26 = arith.divf %24, %25 : vector<4x512xf32>
    %cst_9 = arith.constant 1.000000e+00 : f32
    %27 = vector.broadcast %cst_9 : f32 to vector<4x512xf32>
    %28 = arith.addf %26, %27 : vector<4x512xf32>
    %29 = math.log %28 : vector<4x512xf32>
    %30 = arith.mulf %22, %29 : vector<4x512xf32>
    %cst_10 = arith.constant 5.000000e-01 : f32
    %31 = vector.broadcast %cst_10 : f32 to vector<4x512xf32>
    %32 = arith.mulf %31, %16 : vector<4x512xf32>
    %33 = arith.subf %30, %32 : vector<4x512xf32>
    %cst_11 = arith.constant 1.500000e+00 : f32
    %34 = vector.broadcast %cst_11 : f32 to vector<4x512xf32>
    %35 = arith.mulf %34, %16 : vector<4x512xf32>
    %cst_12 = arith.constant 0.0785935446 : f32
    %36 = vector.broadcast %cst_12 : f32 to vector<4x512xf32>
    %37 = arith.addf %35, %36 : vector<4x512xf32>
    %cst_13 = arith.constant 5.000000e-01 : f32
    %38 = vector.broadcast %cst_13 : f32 to vector<4x512xf32>
    %39 = arith.subf %37, %38 : vector<4x512xf32>
    %cst_14 = arith.constant 1.000000e+00 : f32
    %40 = vector.broadcast %cst_14 : f32 to vector<4x512xf32>
    %41 = arith.cmpf olt, %16, %40 : vector<4x512xf32>
    %42 = arith.select %41, %33, %39 : vector<4x512xi1>, vector<4x512xf32>
    %cst_15 = arith.constant 0.000000e+00 : f32
    %43 = vector.shape_cast %9 : vector<1x512xi1> to vector<1x512xi1>
    %44 = vector.broadcast %43 : vector<1x512xi1> to vector<4x512xi1>
    %45 = vector.broadcast %cst_15 : f32 to vector<4x512xf32>
    %46 = arith.select %44, %42, %45 : vector<4x512xi1>, vector<4x512xf32>
    %c0_16 = arith.constant 0 : index
    %c0_17 = arith.constant 0 : index
    %47 = vector.load %arg2[%c0_16, %c0_17] : memref<2x512xf32, #tpu.memory_space<vmem>>, vector<1x512xf32>
    %c1 = arith.constant 1 : index
    %c0_18 = arith.constant 0 : index
    %48 = vector.load %arg2[%c1, %c0_18] : memref<2x512xf32, #tpu.memory_space<vmem>>, vector<1x512xf32>
    %49 = arith.subf %47, %48 : vector<1x512xf32>
    %cst_19 = arith.constant 0.000000e+00 : f32
    %50 = vector.broadcast %cst_19 : f32 to vector<1x512xf32>
    %51 = arith.maximumf %49, %50 : vector<1x512xf32>
    %52 = math.absf %49 : vector<1x512xf32>
    %cst_20 = arith.constant 0.000000e+00 : f32
    %53 = vector.broadcast %cst_20 : f32 to vector<1x512xf32>
    %54 = arith.subf %53, %52 : vector<1x512xf32>
    %55 = math.exp %54 : vector<1x512xf32>
    %cst_21 = arith.constant 1.000000e+00 : f32
    %56 = vector.broadcast %cst_21 : f32 to vector<1x512xf32>
    %57 = arith.addf %56, %55 : vector<1x512xf32>
    %58 = math.log %57 : vector<1x512xf32>
    %59 = arith.addf %51, %58 : vector<1x512xf32>
    %60 = arith.subf %59, %49 : vector<1x512xf32>
    %cst_22 = arith.constant -1.000000e+00 : f32
    %61 = vector.broadcast %cst_22 : f32 to vector<1x512xf32>
    %62 = arith.select %12, %60, %61 : vector<1x512xi1>, vector<1x512xf32>
    %c0_23 = arith.constant 0 : index
    %c0_24 = arith.constant 0 : index
    %63 = vector.load %arg5[%c0_23, %c0_24] : memref<1x512xf32, #tpu.memory_space<vmem>>, vector<1x512xf32>
    tpu.vector_store %arg5[%c0_23, %c0_24], %62 {strides = array<i32>} : memref<1x512xf32, #tpu.memory_space<vmem>>, vector<1x512xf32>,
    %cst_25 = arith.constant 0.000000e+00 : f32
    %64 = vector.broadcast %cst_25 : f32 to vector<1x512xf32>
    %65 = arith.select %9, %59, %64 : vector<1x512xi1>, vector<1x512xf32>
    %cst_26 = arith.constant 0.000000e+00 : f32
    %66 = vector.broadcast %cst_26 : f32 to vector<1x512xf32>
    %67 = arith.cmpf one, %59, %66 : vector<1x512xf32>
    %68 = arith.andi %9, %67 : vector<1x512xi1>
    %cst_27 = arith.constant 1.000000e+00 : f32
    %cst_28 = arith.constant 0.000000e+00 : f32
    %69 = vector.broadcast %cst_27 : f32 to vector<1x512xf32>
    %70 = vector.broadcast %cst_28 : f32 to vector<1x512xf32>
    %71 = arith.select %68, %69, %70 : vector<1x512xi1>, vector<1x512xf32>
    %72 = arith.extui %9 : vector<1x512xi1> to vector<1x512xi32>
    %73 = arith.sitofp %72 : vector<1x512xi32> to vector<1x512xf32>
    %74 = arith.extui %12 : vector<1x512xi1> to vector<1x512xi32>
    %75 = arith.sitofp %74 : vector<1x512xi32> to vector<1x512xf32>
    %76 = tpu.concatenate %46, %65, %71, %73, %75 in 0 : vector<4x512xf32>, vector<1x512xf32>, vector<1x512xf32>, vector<1x512xf32>, vector<1x512xf32> -> vector<8x512xf32>
    %cst_29 = arith.constant dense<0.000000e+00> : vector<8xf32>
    %77 = vector.multi_reduction <add>, %76, %cst_29 [1] : vector<8x512xf32> to vector<8xf32>
    %78 = vector.shape_cast %77 : vector<8xf32> to vector<8x1xf32>
    %79 = vector.shape_cast %78 : vector<8x1xf32> to vector<8x1xf32>
    %80 = vector.broadcast %79 : vector<8x1xf32> to vector<8x128xf32>
    %c0_30 = arith.constant 0 : index
    %c0_31 = arith.constant 0 : index
    %81 = vector.load %arg6[%c0_30, %c0_31] : memref<8x128xf32, #tpu.memory_space<vmem>>, vector<8x128xf32>
    tpu.vector_store %arg6[%c0_30, %c0_31], %80 {strides = array<i32>} : memref<8x128xf32, #tpu.memory_space<vmem>>, vector<8x128xf32>,
    return
  }
  func.func @transform_0(%arg0: i32) -> (i32, i32) {
    %c0_i32 = arith.constant 0 : i32
    %c0_i32_0 = arith.constant 0 : i32
    return %c0_i32, %arg0 : i32, i32
  }
  func.func @transform_1(%arg0: i32) -> (i32, i32) {
    %c0_i32 = arith.constant 0 : i32
    %c0_i32_0 = arith.constant 0 : i32
    return %c0_i32, %arg0 : i32, i32
  }
  func.func @transform_2(%arg0: i32) -> (i32, i32) {
    %c0_i32 = arith.constant 0 : i32
    %c0_i32_0 = arith.constant 0 : i32
    return %c0_i32, %arg0 : i32, i32
  }
  func.func @transform_3(%arg0: i32) -> (i32, i32) {
    %c0_i32 = arith.constant 0 : i32
    %c0_i32_0 = arith.constant 0 : i32
    return %c0_i32, %arg0 : i32, i32
  }
  func.func @transform_4(%arg0: i32) -> (i32, i32) {
    %c0_i32 = arith.constant 0 : i32
    %c0_i32_0 = arith.constant 0 : i32
    return %c0_i32, %arg0 : i32, i32
  }
  func.func @transform_5(%arg0: i32) -> (i32, i32) {
    %c0_i32 = arith.constant 0 : i32
    %c0_i32_0 = arith.constant 0 : i32
    return %arg0, %c0_i32 : i32, i32
  }
}

</mosaic_0001>

<bundles_post_ra>
// kernel: multibox_loss.1
= control target key start
LH: loop header
LB: loop body
LE: loop exit
PB: predicated region body
PF: predicated region fallthrough
CT: control target
= control target key end

     0   :  { %11 = vsyncpa [#allocation3], 0  ;;  %s1330_s0 = inlined_call_operand.vmem [shape: s32[1,1024], index: 0, kind: input, shape index: {}]   ;;  %s1331_s1 = inlined_call_operand.vmem [shape: f32[2,1024], index: 1, kind: input, shape index: {}]   ;;  %s1332_s2 = inlined_call_operand.hbm [shape: f32[4,1024], index: 2, kind: input, shape index: {}]   ;;  %s1333_s3 = inlined_call_operand.hbm [shape: f32[4,1024], index: 3, kind: input, shape index: {}]   ;;  %s1334_s4 = inlined_call_operand.vmem [shape: f32[1,1024], index: 4, kind: output, shape index: {0}]   ;;  %s1335_s5 = inlined_call_operand.vmem [shape: f32[16,128], index: 5, kind: output, shape index: {1}]  }
   0x1   :  { %13 = vsyncpa [#allocation3 + $0x1], 0 }
   0x2   :  { %14 = vsyncpa [#allocation5], 0 }
   0x3   :  { %16 = vsyncpa [#allocation5 + $0x1], 0  ;;  %s964_s18 = smov 0   ;;  %s966_s19 = smov 0  }
   0x4   :  { %s968_s20 = smov 0   ;;  %s970_s21 = smov 0  }
   0x5 LB: > { %s983_s22 = sadd.s32 4294967295, %s930_s21   ;;  %s986_s23 = sadd.s32 1, %s930_s21   ;;  %s930_s21 = sphi %s970_s21, %s1375_s21   ;;  %s926_s20 = sphi %s968_s20, %s1374_s20   ;;  %s922_s19 = sphi %s966_s19, %s1373_s19   ;;  %s918_s18 = sphi %s964_s18, %s1372_s18  }
   0x6   : > { %s78_s24 = ssub.s32 %s930_s21, %s986_s23  ;;  %s81_s25 = sadd.s32 1, %s926_s20 }
   0x7   : > { %p79_p0 = scmp.eq.s32.totalorder %s78_s24, 0  ;;  %p88_p1 = scmp.ne.s32.totalorder %s926_s20, %s922_s19 }
   0x8   : > { %p89_p2 = scmp.eq.s32.totalorder %s930_s21, 0  ;;  %p94_p3 = scmp.ne.s32.totalorder %s922_s19, %s918_s18 }
   0x9   : > { %s996_s26 = scalar_select %p79_p0, %s926_s20, %s81_s25  }
   0xa   : > { %p998_p4 = por %p89_p2, %p88_p1  ;;  %p95_p5 = scmp.eq.s32.totalorder %s983_s22, 0 }
   0xb   : > { %p789_p6 = scmp.lt.s32.totalorder %s930_s21, 2  ;;  %s1009_s29 = sand.u32 1, %s926_s20  }
   0xc   : > { %p1004_p7 = por %p95_p5, %p94_p3  ;;  %s748_s30 = sshll.u32 %s1009_s29, 4 }
   0xd   : > { %s776_s6 = sshll.u32 %s930_s21, 4  ;;  %s217_s10 = scalar_lea.vmem [#allocation2], %s748_s30 }
   0xe   : > { %s222_s9 = scalar_lea.hbm %s1332_s2, %s776_s6  ;;  %s226_s11 = sshll.u32 %s217_s10, 4  ;;  %s227_s11 = int_to_ptr.vmem [resolvable:$true] %s226_s11 }
   0xf   : > { %s224_s12 = sshll.u32 %s222_s9, 4  ;;  %p1018_p8 = pnand %p789_p6, %p998_p4  ;;  %s225_s12 = int_to_ptr.hbm [resolvable:$true] %s224_s12 }
  0x10   : > { %p754_p9 = scmp.ge.s32.totalorder %s930_s21, 1  ;;  %p251_p10 = scmp.lt.s32.totalorder %s930_s21, 3 }
  0x11   : > { %s214_s14 = scalar_lea.sflag [#allocation3], %s1009_s29  ;;  %s832_s15 = sshra.s32 %s225_s12, 4  ;;  %s833_s15 = int_to_ptr.hbm [resolvable:$true] %s832_s15 }
  0x12   : > { %s834_s16 = scalar_lea.hbm %s833_s15, 16  ;;  %p836_p12 = pneg %p1018_p8 }
  0x13   : > { %p835_p11 = scmp.ne.s32.totalorder %s833_s15, %s834_s16  ;;  %s839_s24 = scalar_lea.hbm %s1332_s2, 32 }
  0x14   : > { %p840_p1 = scmp.lt.s32.totalorder %s833_s15, %s1332_s2  ;;  %p841_p2 = scmp.lt.s32.totalorder %s839_s24, %s834_s16 }
  0x15   : > { %p837_p13 = pnand %p836_p12, %p835_p11 }
  0x16   : > { %p842_p3 = por %p841_p2, %p840_p1 }
  0x17   : > { %p838_p0 = pneg %p837_p13 }
  0x19   : > { %p843_p4 = pnand %p842_p3, %p838_p0 }
  0x1b   : > { %846 = shalt.err (!%p843_p4)
}
  0x1c   : > { %785 = dma.hbm_to_vmem [thread:$0]  (!%p1018_p8), %s225_s12, 256, %s227_s11, %s214_s14  }
  0x1d   : > { %p1042_p5 = pnand %p754_p9, %p251_p10  ;;  %s242_s10 = scalar_lea.hbm %s1333_s3, %s776_s6 }
  0x1e   : > { %s237_s15 = scalar_lea.vmem [#allocation4], %s748_s30  ;;  %s244_s17 = sshll.u32 %s242_s10, 4  ;;  %s245_s17 = int_to_ptr.hbm [resolvable:$true] %s244_s17 }
  0x1f   : > { %s246_s16 = sshll.u32 %s237_s15, 4  ;;  %s234_s18 = scalar_lea.sflag [#allocation5], %s1009_s29  ;;  %s247_s16 = int_to_ptr.vmem [resolvable:$true] %s246_s16 }
  0x20   : > { %s862_s24 = sshra.s32 %s245_s17, 4  ;;  %s869_s12 = scalar_lea.hbm %s1333_s3, 32  ;;  %s863_s24 = int_to_ptr.hbm [resolvable:$true] %s862_s24 }
  0x21   : > { %s864_s25 = scalar_lea.hbm %s863_s24, 16  ;;  %p870_p11 = scmp.lt.s32.totalorder %s863_s24, %s1333_s3 }
  0x22   : > { %p865_p6 = scmp.ne.s32.totalorder %s863_s24, %s864_s25  ;;  %p871_p13 = scmp.lt.s32.totalorder %s869_s12, %s864_s25 }
  0x24   : > { %p867_p9 = pnand %p865_p6, %p836_p12  ;;  %p872_p0 = por %p871_p13, %p870_p11 }
  0x26   : > { %p868_p10 = pneg %p867_p9 }
  0x28   : > { %p873_p1 = pnand %p872_p0, %p868_p10 }
  0x2a   : > { %876 = shalt.err (!%p873_p1)
}
  0x2b   : > { %788 = dma.hbm_to_vmem [thread:$0]  (!%p1018_p8), %s245_s17, 256, %s247_s16, %s234_s18  }
  0x2c   : > { %255 = sbr.rel (%p1042_p5) target bundleno = 229 (0xe5), region = 36  ;;  %s257_s29 = sand.u32 (!%p1042_p5), 1, %s922_s19  }
  0x2d   : > { %s755_s30 = sshll.u32 (!%p1042_p5), %s257_s29, 4  ;;  %s258_s27 = scalar_lea.sflag (!%p1042_p5), [#allocation3], %s257_s29 }
  0x2e   : > { %s261_s8 = scalar_lea.vmem (!%p1042_p5), [#allocation2], %s755_s30 }
  0x31   : > { %909 = dma.done.wait (%p1004_p7), %s258_s27, 256  }
  0x32   : > { %911 = vsyncadd (%p1004_p7), %s258_s27, 4294967040  ;;  %s268_s9 = scalar_lea.sflag [#allocation5], %s257_s29  ;;  %s271_s10 = scalar_lea.vmem [#allocation4], %s755_s30 }
  0x33   : > { %913 = dma.done.wait (%p1004_p7), %s268_s9, 256  }
  0x34   : > { %915 = vsyncadd (%p1004_p7), %s268_s9, 4294967040  ;;  %s757_s13 = sshll.u32 %s983_s22, 2  ;;  %v382_v0 = vld [vmem:[%s261_s8] sm:$0xff]  ;;  %v383_v1 = vld [vmem:[%s261_s8 + $0x8] sm:$0xff]  ;;  %v340_v8 = vlaneseq  ;;  %s762_s25 = sshll.u32 %s983_s22, 9  ;;  %v932_v24 = vmov 0  }
  0x35   : > { %p317_p8 = scmp.lt.s32.totalorder %s757_s13, 7  ;;  %v384_v2 = vld [vmem:[%s271_s10] sm:$0xff]  ;;  %v385_v3 = vld [vmem:[%s271_s10 + $0x8] sm:$0xff]  ;;  %v345_v21 = vstv %s762_s25  ;;  %p334_p7 = scmp.lt.s32.totalorder %s983_s22, 1 }
  0x36   : > { %v386_v4 = vsub.f32 %v382_v0, %v384_v2  ;;  %v387_v5 = vsub.f32 %v383_v1, %v385_v3  ;;  %v341_v14 = vand.u32 127, %v340_v8 }
  0x37   : > { %s1377_s13 = smov (!%p317_p8, %s757_s13), 7  ;;  %s1379_s22 = smov (!%p334_p7, %s983_s22), 1 }
  0x38   : > { %v388_v6 = vand.u32 2147483647, %v386_v4  ;;  %v1075_v7 = vand.u32 2147483647, %v387_v5  ;;  %s759_s7 = sshll.u32 %s1377_s13, 1  ;;  %s319_s16 = scalar_lea.vmem %s1330_s0, %s1377_s13  ;;  %v342_v18 = vadd.s32 128, %v341_v14  ;;  %v346_v33 = vadd.s32 %v345_v21, %v341_v14 }
  0x39   : > { %s325_s24 = scalar_lea.vmem %s1331_s1, %s759_s7  ;;  %v338_v13 = vld [vmem:[%s319_s16] sm:$0xf]  ;;  %v343_v20 = vadd.s32 256, %v341_v14  ;;  %v344_v23 = vadd.s32 384, %v341_v14  ;;  %s332_s12 = scalar_lea.vmem %s1334_s4, %s1377_s13 }
  0x3a   : > { %v390_v9 = vmul.f32 19.085537, %v388_v6  ;;  %v391_v10 = vmul.f32 19.085537, %v1075_v7  ;;  %v406_v15 = vmul.f32 1.5, %v388_v6  ;;  %vm354_vm0 = vcmp.eq.s32.totalorder %v338_v13, 1 }
  0x3b   : > { %v445_v16 = vld [vmem:[%s325_s24] ss:$2 sm:$0xf]  ;;  %v407_v17 = vmul.f32 1.5, %v1075_v7  ;;  %v355_v25 = vsel %vm354_vm0, 1, %v932_v24  ;;  %v347_v34 = vadd.s32 %v345_v21, %v342_v18  ;;  %v402_v36 = vmul.f32 0.5, %v388_v6 }
  0x3c   : > { %v392_v11 = vadd.f32 1.0, %v390_v9  ;;  %v393_v12 = vadd.f32 1.0, %v391_v10  ;;  %v765_v19 = vld [vmem:[%s325_s24 + $0x1] ss:$2 sm:$0xf]  ;;  %vm368_vm1 = vcmp.eq.s32.totalorder %v338_v13, 0  ;;  %v348_v47 = vadd.s32 %v345_v21, %v343_v20 }
  0x3d   : > { %v1089_v22 = vsub.f32 %v445_v16, %v765_v19  ;;  %v408_v27 = vadd.f32 0.078593545, %v406_v15  ;;  %v409_v30 = vadd.f32 0.078593545, %v407_v17  ;;  %v403_v38 = vmul.f32 0.5, %v1075_v7  ;;  %s761_s14 = sshll.u32 %s1379_s22, 3 }
  0x3e   : > { %824 = vlog2.f32 %v392_v11  ;;  %v394_v26 = vmul.f32 0.026197849, %v392_v11  ;;  %v395_v29 = vmul.f32 0.026197849, %v393_v12  ;;  %v356_v40 = vperm.slane %v355_v25, 0  ;;  %s337_s30 = scalar_lea.vmem %s1335_s5, %s761_s14 }
  0x3f   : > { %826 = vlog2.f32 %v393_v12  ;;  %v450_v31 = vand.u32 2147483647, %v1089_v22  ;;  %v357_v41 = vperm.slane %v355_v25, 1  ;;  %v763_v43 = vadd.f32 -0.5, %v408_v27 }
  0x40   : > { %v764_v45 = vadd.f32 -0.5, %v409_v30  ;;  %vm412_vm2 = vcmp.lt.f32.partialorder %v388_v6, 1.0  ;;  %vm413_vm3 = vcmp.lt.f32.partialorder %v1075_v7, 1.0  ;;  %v358_v49 = vperm.slane %v355_v25, 2 }
  0x41   : > { %v451_v39 = vsub.f32 0.0, %v450_v31  ;;  %v369_v50 = vsel %vm368_vm1, 1, %v932_v24  ;;  %v349_v52 = vadd.s32 %v345_v21, %v344_v23  ;;  %vm350_vm4 = vcmp.lt.s32.totalorder %v346_v33, 1024 }
  0x42   : > { %vm360_vm5 = vcmp.ne.s32.totalorder %v356_v40, 0  ;;  %vm351_vm6 = vcmp.lt.s32.totalorder %v347_v34, 1024  ;;  %v359_v54 = vperm.slane %v355_v25, 3  ;;  %vm361_vm7 = vcmp.ne.s32.totalorder %v357_v41, 0 }
  0x43   : > { %v452_v46 = vmul.f32 1.442695, %v451_v39  ;;  %v370_v56 = vperm.slane %v369_v50, 0  ;;  %vm352_vm8 = vcmp.lt.s32.totalorder %v348_v47, 1024  ;;  %vm362_vm9 = vcmp.ne.s32.totalorder %v358_v49, 0  ;;  %vm1098_vm10 = vmand %vm350_vm4, %vm360_vm5 }
  0x44   : > { %v825_v28 = vpop.eup %824  ;;  %v371_v58 = vperm.slane %v369_v50, 1  ;;  %vm1103_vm11 = vmand %vm351_vm6, %vm361_vm7  ;;  %v372_v60 = vperm.slane %v369_v50, 2  ;;  %vm353_vm12 = vcmp.lt.s32.totalorder %v349_v52, 1024  ;;  %vm363_vm13 = vcmp.ne.s32.totalorder %v359_v54, 0 }
  0x45   : > { %v827_v32 = vpop.eup %826  ;;  %v397_v35 = vmul.f32 0.6931472, %v825_v28  ;;  %828 = vpow2.f32 %v452_v46  ;;  %v373_v62 = vperm.slane %v369_v50, 3  ;;  %vm1108_vm14 = vmand %vm352_vm8, %vm362_vm9  ;;  %vm374_vm15 = vcmp.ne.s32.totalorder %v370_v56, 0 }
  0x46   : > { %v399_v37 = vmul.f32 0.6931472, %v827_v32  ;;  %vm375_vm0 = vcmp.ne.s32.totalorder %v371_v58, 0  ;;  %v416_v1 = vsel %vm1098_vm10, 1, %v932_v24  ;;  %v417_v2 = vsel %vm1103_vm11, 1, %v932_v24  ;;  %vm1119_vm1 = vmand %vm353_vm12, %vm363_vm13 }
  0x47   : > { %v400_v42 = vmul.f32 %v397_v35, %v394_v26  ;;  %vm1124_vm5 = vmand %vm350_vm4, %vm374_vm15  ;;  %v418_v5 = vsel %vm1108_vm14, 1, %v932_v24  ;;  %v420_v7 = vperm.slane %v416_v1, 0  ;;  %v421_v9 = vperm.slane %v417_v2, 0 }
  0x48   : > { %v401_v44 = vmul.f32 %v399_v37, %v395_v29  ;;  %vm1132_vm7 = vmand %vm351_vm6, %vm375_vm0  ;;  %v419_v11 = vsel %vm1119_vm1, 1, %v932_v24  ;;  %v422_v13 = vperm.slane %v418_v5, 0  ;;  %v449_v14 = vmax.f32 %v1089_v22, 0.0 }
  0x49   : > { %v404_v48 = vsub.f32 %v400_v42, %v402_v36  ;;  %v933_v15 = vmov 0.0   ;;  %v423_v21 = vperm.slane %v419_v11, 0  ;;  %vm1170_vm6 = vcmp.eq.s32.totalorder %v420_v7, 1 }
  0x4a   : > { %v405_v51 = vsub.f32 %v401_v44, %v403_v38  ;;  %v1153_v16 = vsel %vm1098_vm10, 1.0, %v933_v15  ;;  %v1158_v17 = vsel %vm1103_vm11, 1.0, %v933_v15  ;;  %v1163_v18 = vsel %vm1108_vm14, 1.0, %v933_v15 }
  0x4b   : > { %v414_v53 = vsel %vm412_vm2, %v404_v48, %v763_v43  ;;  %v829_v61 = vpop.eup %828  ;;  %vm376_vm2 = vcmp.ne.s32.totalorder %v372_v60, 0  ;;  %v1168_v19 = vsel %vm1119_vm1, 1.0, %v933_v15  ;;  %v1181_v26 = vsel %vm1124_vm5, 1.0, %v933_v15 }
  0x4c   : > { %v415_v55 = vsel %vm413_vm3, %v405_v51, %v764_v45  ;;  %430 = vst [vmem:[#allocation1] ss:$2 sm:$0xff] %v414_v53  ;;  %v454_v0 = vadd.f32 1.0, %v829_v61  ;;  %vm377_vm3 = vcmp.ne.s32.totalorder %v373_v62, 0  ;;  %vm1137_vm9 = vmand %vm352_vm8, %vm376_vm2  ;;  %vm1174_vm8 = vcmp.eq.s32.totalorder %v421_v9, 1 }
  0x4d   : > { %432 = vst [vmem:[#allocation1 + $0x10] ss:$2 sm:$0xff] %v415_v55  ;;  %vm1145_vm4 = vmand %vm353_vm12, %vm377_vm3  ;;  %vm479_vm12 = vcmask 1040384   ;;  %v1186_v28 = vsel %vm1132_vm7, 1.0, %v933_v15  ;;  %v1191_v29 = vsel %vm1137_vm9, 1.0, %v933_v15  ;;  %v562_v31 = vrot.slane %v1153_v16, 2 }
  0x4e   : > { %830 = vlog2.f32 %v454_v0  ;;  %v1196_v30 = vsel %vm1145_vm4, 1.0, %v933_v15  ;;  %v563_v32 = vrot.slane %v1158_v17, 2  ;;  %v564_v33 = vrot.slane %v1163_v18, 2 }
  0x4f   : > { %v565_v34 = vrot.slane %v1168_v19, 2  ;;  %vm1202_vm0 = vcmp.eq.s32.totalorder %v422_v13, 1  ;;  %vm1209_vm2 = vcmp.lt.s32.totalorder %v340_v8, 512  ;;  %vm1213_vm3 = vcmp.eq.s32.totalorder %v423_v21, 1 }
  0x50   : > { %v574_v41 = vrot.slane %v1181_v26, 1  ;;  %v575_v42 = vrot.slane %v1186_v28, 1  ;;  %v576_v43 = vrot.slane %v1191_v29, 1  ;;  %vm582_vm15 = vcmask 1043456  }
  0x53   : > { %v433_v36 = vld.sshfl [vmem:[#allocation1] sm:$0xff pattern:$0x75316420]  ;;  %v1206_v37 = vld.sshfl [vmem:[#allocation1 + $0x8] sm:$0xff pattern:$0x75316420] }
  0x54   : > { %v831_v20 = vpop.eup %830  ;;  %v441_v8 = vsel %vm1170_vm6, %v433_v36, 0.0  ;;  %v442_v48 = vsel %vm1174_vm8, %v1206_v37, 0.0  ;;  %v435_v58 = vld.sshfl [vmem:[#allocation1 + $0x10] sm:$0xff pattern:$0x75316420] }
  0x55   : > { %v456_v27 = vmul.f32 0.6931472, %v831_v20  ;;  %v436_v13 = vld.sshfl [vmem:[#allocation1 + $0x18] sm:$0xff pattern:$0x75316420]  ;;  %v443_v23 = vsel %vm1202_vm0, %v435_v58, 0.0 }
  0x56   : > { %v444_v37 = vsel %vm1213_vm3, %v436_v13, 0.0  ;;  %vm587_vm0 = vcmask 1044480   ;;  %vm597_vm3 = vcmask 1046528  }
  0x57   : > { %v457_v38 = vadd.f32 %v456_v27, %v449_v14 }
  0x59   : > { %v458_v44 = vsub.f32 %v457_v38, %v1089_v22  ;;  %v492_v45 = vperm.slane %v457_v38, 0  ;;  %v493_v46 = vperm.slane %v457_v38, 1  ;;  %v494_v47 = vperm.slane %v457_v38, 2 }
  0x5a   : > { %v495_v49 = vperm.slane %v457_v38, 3  ;;  %vm504_vm13 = vcmp.ne.f32.partialorder %v457_v38, 0.0 }
  0x5b   : > { %v460_v50 = vperm.slane %v458_v44, 0  ;;  %v461_v51 = vperm.slane %v458_v44, 1  ;;  %v462_v52 = vperm.slane %v458_v44, 2  ;;  %v463_v53 = vperm.slane %v458_v44, 3 }
  0x5c   : > { %v500_v22 = vsel %vm1098_vm10, %v492_v45, 0.0  ;;  %v501_v54 = vsel %vm1103_vm11, %v493_v46, 0.0  ;;  %v502_v55 = vsel %vm1108_vm14, %v494_v47, 0.0  ;;  %v503_v56 = vsel %vm1119_vm1, %v495_v49, 0.0 }
  0x5d   : > { %v468_v60 = vsel %vm1124_vm5, %v460_v50, -1.0  ;;  %v469_v61 = vsel %vm1132_vm7, %v461_v51, -1.0  ;;  %v470_v62 = vsel %vm1137_vm9, %v462_v52, -1.0  ;;  %v471_v0 = vsel %vm1145_vm4, %v463_v53, -1.0 }
  0x5e   : > { %v476_v1 = vrot.slane %v469_v61, 7  ;;  %v477_v2 = vrot.slane %v470_v62, 6  ;;  %v478_v5 = vrot.slane %v471_v0, 5  ;;  %v505_v7 = vsel %vm504_vm13, 1, %v932_v24 }
  0x5f   : > { %v506_v4 = vperm.slane %v505_v7, 0  ;;  %v507_v9 = vperm.slane %v505_v7, 1  ;;  %v508_v6 = vperm.slane %v505_v7, 2  ;;  %v509_v11 = vperm.slane %v505_v7, 3 }
  0x60   : > { %v480_v10 = vsel %vm479_vm12, %v468_v60, %v476_v1  ;;  %vm1366_vm5 = vcmask 1042434   ;;  %v538_v14 = vrot.slane %v500_v22, 4  ;;  %v539_v20 = vrot.slane %v501_v54, 4 }
  0x61   : > { %v482_v12 = vsel %vm1366_vm5, %v477_v2, %v478_v5  ;;  %vm1367_vm7 = vcmask 1041408   ;;  %vm510_vm9 = vcmp.ne.s32.totalorder %v506_v4, 0  ;;  %vm511_vm4 = vcmp.ne.s32.totalorder %v507_v9, 0 }
  0x62   : > { %v484_v21 = vsel %vm1367_vm7, %v480_v10, %v482_v12  ;;  %vm1251_vm6 = vcmp.ne.s32.totalorder %v508_v6, 0  ;;  %vm1259_vm8 = vcmp.ne.s32.totalorder %v509_v11, 0  ;;  %vm514_vm12 = vmand %vm1098_vm10, %vm510_vm9  ;;  %v540_v27 = vrot.slane %v502_v55, 4 }
  0x63   : > { %490 = vst.msk [vmem:[%s332_s12] sm:$0xf] %vm1209_vm2, %v484_v21  ;;  %v541_v36 = vrot.slane %v503_v56, 4  ;;  %vm515_vm13 = vmand %vm1103_vm11, %vm511_vm4  ;;  %v518_v35 = vsel %vm514_vm12, 1.0, %v933_v15  ;;  %v583_v38 = vsel %vm582_vm15, %v441_v8, %v538_v14  ;;  %v584_v44 = vsel %vm582_vm15, %v442_v48, %v539_v20 }
  0x64   : > { %vm516_vm2 = vmand %vm1108_vm14, %vm1251_vm6  ;;  %v519_v57 = vsel %vm515_vm13, 1.0, %v933_v15  ;;  %v550_v39 = vrot.slane %v518_v35, 3  ;;  %vm592_vm10 = vcmask 1045504   ;;  %v585_v45 = vsel %vm582_vm15, %v443_v23, %v540_v27 }
  0x65   : > { %vm517_vm11 = vmand %vm1119_vm1, %vm1259_vm8  ;;  %v520_v59 = vsel %vm516_vm2, 1.0, %v933_v15  ;;  %v551_v40 = vrot.slane %v519_v57, 3  ;;  %v586_v47 = vsel %vm582_vm15, %v444_v37, %v541_v36  ;;  %v577_v49 = vrot.slane %v1196_v30, 1 }
  0x66   : > { %v521_v63 = vsel %vm517_vm11, 1.0, %v933_v15  ;;  %v552_v46 = vrot.slane %v520_v59, 3  ;;  %v588_v8 = vsel %vm587_vm0, %v583_v38, %v550_v39 }
  0x67   : > { %v553_v48 = vrot.slane %v521_v63, 3  ;;  %v589_v3 = vsel %vm587_vm0, %v584_v44, %v551_v40  ;;  %v593_v50 = vsel %vm592_vm10, %v588_v8, %v562_v31 }
  0x68   : > { %v590_v51 = vsel %vm587_vm0, %v585_v45, %v552_v46  ;;  %v594_v15 = vsel %vm592_vm10, %v589_v3, %v563_v32  ;;  %v598_v52 = vsel %vm597_vm3, %v593_v50, %v574_v41 }
  0x69   : > { %v591_v30 = vsel %vm587_vm0, %v586_v47, %v553_v48  ;;  %v595_v53 = vsel %vm592_vm10, %v590_v51, %v564_v33  ;;  %v599_v16 = vsel %vm597_vm3, %v594_v15, %v575_v42 }
  0x6a   : > { %v596_v17 = vsel %vm592_vm10, %v591_v30, %v565_v34  ;;  %v600_v26 = vsel %vm597_vm3, %v595_v53, %v576_v43  ;;  %v602_v31 = vadd.f32 %v599_v16, %v598_v52 }
  0x6b   : > { %v601_v32 = vsel %vm597_vm3, %v596_v17, %v577_v49 }
  0x6c   : > { %v603_v41 = vadd.f32 %v602_v31, %v600_v26 }
  0x6e   : > { %v604_v22 = vadd.f32 %v603_v41, %v601_v32 }
  0x70   : > { %605 = vadd.xlane.f32.xlu0 %v604_v22 }
  0xe3   : > { %v606_v18 = vpop.xlane.xlu0 %605 }
  0xe4   : > { %607 = vst [vmem:[%s337_s30] sm:$0xff] %v606_v18 }
  0xe5 PF: > { %p19_p12 = scmp.ge.s32.totalorder %s986_s23, 4   ;;  %s1372_s18 = smov %s922_s19 }
  0xe6   : > { %s1373_s19 = smov %s926_s20  ;;  %s1374_s20 = smov %s996_s26 }
  0xe7   : > { %s1375_s21 = smov %s986_s23  ;;  %21 = sbr.rel (!%p19_p12) target bundleno = 5 (0x5), region = 109 }
  0xec   :  { %642 = vsyncpa [#allocation3], 1 }
  0xed   :  { %644 = vsyncpa [#allocation3 + $0x1], 1 }
  0xee   :  { %645 = vsyncpa [#allocation5], 1 }
  0xef   :  { %647 = vsyncpa [#allocation5 + $0x1], 1 }

</bundles_post_ra>
